<compile_context>
chip_gen: v6e
topology: v6e:2x2x1
jax: 0.10.0
libtpu: 0.0.40
codegen_flags: <defaults>
</compile_context>

<pallas_src>
import jax
import jax.numpy as jnp
from jax.experimental import pallas as pl
from jax.experimental.pallas import tpu as pltpu

HIDDEN = 256


def _soft_q_kernel(xa_ref, w1_ref, b1_ref, w2_ref, b2_ref, w3_ref, b3_ref, out_ref):
    # fc1: single K=128 matmul over the zero-padded [obs | act | 0] features.
    h1 = jnp.dot(xa_ref[...], w1_ref[...], preferred_element_type=jnp.float32)
    h1 = jnp.maximum(h1 + b1_ref[...], 0.0)                       # (TB, 256) f32

    # fc2 + ReLU.
    h2 = jnp.dot(h1.astype(jnp.bfloat16), w2_ref[...],
                 preferred_element_type=jnp.float32)
    h2 = jnp.maximum(h2 + b2_ref[...], 0.0)                       # (TB, 256) f32

    # fc3 as a trans-B contraction so q comes out lane-dense:
    #   (8, 256) . (TB, 256)^T -> (8, TB); only row 0 is meaningful.
    q = jax.lax.dot_general(
        w3_ref[...], h2,
        dimension_numbers=(((1,), (1,)), ((), ())),
        preferred_element_type=jnp.float32)
    out_ref[...] = q[0:1, :] + b3_ref[0]                          # (1, TB) f32


def _round_up(n, m):
    return ((n + m - 1) // m) * m


def prepare_params(params, obs_dim, act_dim):
    """One-time (per parameter update) packing of weights into kernel layout."""
    w1, b1, w2, b2, w3, b3 = params
    feat = obs_dim + act_dim
    k1 = _round_up(feat, 128)                                     # padded fc1 K
    w1_pad = jnp.zeros((k1, HIDDEN), jnp.bfloat16)
    w1_pad = w1_pad.at[:feat].set(w1.astype(jnp.bfloat16))        # (k1, 256) bf16
    w2_bf = w2.astype(jnp.bfloat16)                               # (256, 256) bf16
    # fc3 as rows: row 0 holds the weight vector, rows 1..7 are zero padding
    # so the trans-B matmul has a sublane-aligned (8, 256) LHS.  Kept in f32.
    w3_rows = jnp.zeros((8, HIDDEN), jnp.float32).at[0].set(w3[:, 0])
    b3_s = b3.reshape(-1)[:1].astype(jnp.float32)                 # (1,) scalar
    return (w1_pad, b1.reshape(1, HIDDEN).astype(jnp.float32), w2_bf,
            b2.reshape(1, HIDDEN).astype(jnp.float32), w3_rows, b3_s)


def soft_q_forward(x, a, prepared, *, block_b=1024):
    """x: (B, obs_dim) f32, a: (B, act_dim) f32 -> (B, 1) f32."""
    w1_pad, b1, w2_bf, b2, w3_rows, b3 = prepared
    B, obs_dim = x.shape
    act_dim = a.shape[1]
    feat = obs_dim + act_dim
    k1 = w1_pad.shape[0]

    # Batch tile: multiple of 128 (lane-dense output row + bf16 packing).
    block_b = _round_up(max(block_b, 128), 128)
    TB = min(block_b, _round_up(B, 128))
    # v7x has 2 TensorCores: keep >= 2 "parallel" grid steps once the batch is
    # large enough that splitting is worth the per-step overhead.
    if B <= block_b and B >= 1024:
        TB = _round_up((B + 1) // 2, 128)
    B_pad = _round_up(B, TB)
    grid = (B_pad // TB,)

    # Fused concat + feature zero-pad + bf16 cast (cheap wrapper-side XLA op).
    xa = jnp.concatenate([x, a], axis=1).astype(jnp.bfloat16)
    xa = jnp.pad(xa, ((0, B_pad - B), (0, k1 - feat)))            # (B_pad, k1)

    flops = 2 * B_pad * (k1 * HIDDEN + HIDDEN * HIDDEN + HIDDEN * 8)
    bytes_accessed = (xa.size * 2 + B_pad * 4
                      + (w1_pad.size + w2_bf.size) * 2
                      + (b1.size + b2.size + w3_rows.size + 1) * 4)
    cost = pl.CostEstimate(flops=flops, transcendentals=0,
                           bytes_accessed=bytes_accessed)

    out = pl.pallas_call(
        _soft_q_kernel,
        out_shape=jax.ShapeDtypeStruct((1, B_pad), jnp.float32),
        grid_spec=pltpu.PrefetchScalarGridSpec(
            num_scalar_prefetch=0,
            grid=grid,
            in_specs=[
                pl.BlockSpec((TB, k1), lambda i: (i, 0)),            # xa tile
                pl.BlockSpec((k1, HIDDEN), lambda i: (0, 0)),        # w1 (resident)
                pl.BlockSpec((1, HIDDEN), lambda i: (0, 0)),         # b1
                pl.BlockSpec((HIDDEN, HIDDEN), lambda i: (0, 0)),    # w2
                pl.BlockSpec((1, HIDDEN), lambda i: (0, 0)),         # b2
                pl.BlockSpec((8, HIDDEN), lambda i: (0, 0)),         # w3 rows (f32)
                pl.BlockSpec(memory_space=pltpu.MemorySpace.SMEM),   # b3 scalar
            ],
            out_specs=pl.BlockSpec((1, TB), lambda i: (0, i)),       # lane-dense q row
        ),
        compiler_params=pltpu.CompilerParams(
            dimension_semantics=("parallel",),
        ),
        cost_estimate=cost,
    )(xa, w1_pad, b1, w2_bf, b2, w3_rows, b3)

    return out[0, :B].reshape(B, 1)


def init_params(key, obs_dim, act_dim, hidden=HIDDEN):
    """Deterministic init matching nn.Linear's U(-1/sqrt(fan_in), 1/sqrt(fan_in))."""
    def linear(key, fan_in, fan_out):
        kw, kb = jax.random.split(key)
        bound = 1.0 / jnp.sqrt(fan_in)
        # stored as (in, out) == PyTorch weight.T
        w = jax.random.uniform(kw, (fan_in, fan_out), jnp.float32, -bound, bound)
        b = jax.random.uniform(kb, (1, fan_out), jnp.float32, -bound, bound)
        return w, b

    k1, k2, k3 = jax.random.split(key, 3)
    w1, b1 = linear(k1, obs_dim + act_dim, hidden)
    w2, b2 = linear(k2, hidden, hidden)
    w3, b3 = linear(k3, hidden, 1)
    return (w1, b1, w2, b2, w3, b3)


def reference_forward_f32(x, a, params):
    w1, b1, w2, b2, w3, b3 = params
    xa = jnp.concatenate([x, a], axis=1)
    h1 = jnp.maximum(xa @ w1 + b1, 0.0)
    h2 = jnp.maximum(h1 @ w2 + b2, 0.0)
    return h2 @ w3 + b3


def reference_forward_matched(x, a, params):
    """Precision-matched reference (bf16 fc1/fc2 operands, f32 fc3, f32 accum)."""
    w1, b1, w2, b2, w3, b3 = params
    xa = jnp.concatenate([x, a], axis=1).astype(jnp.bfloat16)
    h1 = jnp.dot(xa, w1.astype(jnp.bfloat16), preferred_element_type=jnp.float32)
    h1 = jnp.maximum(h1 + b1, 0.0)
    h2 = jnp.dot(h1.astype(jnp.bfloat16), w2.astype(jnp.bfloat16),
                 preferred_element_type=jnp.float32)
    h2 = jnp.maximum(h2 + b2, 0.0)
    q = jnp.dot(h2, w3, precision=jax.lax.Precision.HIGHEST)
    return q + b3


if __name__ == "__main__":
    key = jax.random.PRNGKey(0)
    B, OBS_DIM, ACT_DIM = 8, 17, 6    # small MuJoCo-ish shapes

    k_p, k_x, k_a, k_x2, k_a2 = jax.random.split(key, 5)
    params = init_params(k_p, OBS_DIM, ACT_DIM)
    prepared = prepare_params(params, OBS_DIM, ACT_DIM)

    # Small batch (single-tile grid).
    x = jax.random.normal(k_x, (B, OBS_DIM), jnp.float32)
    a = jax.random.normal(k_a, (B, ACT_DIM), jnp.float32)
    q = soft_q_forward(x, a, prepared)
    jax.block_until_ready(q)
    assert q.shape == (B, 1)

    q_m = reference_forward_matched(x, a, params)
    assert jnp.allclose(q, q_m, atol=5e-3, rtol=5e-3)
    q_f32 = reference_forward_f32(x, a, params)
    assert jnp.allclose(q, q_f32, atol=5e-2, rtol=5e-2)

    # Larger, non-multiple batch exercising the multi-tile lane-dense output.
    B2 = 300
    x2 = jax.random.normal(k_x2, (B2, OBS_DIM), jnp.float32)
    a2 = jax.random.normal(k_a2, (B2, ACT_DIM), jnp.float32)
    q2 = soft_q_forward(x2, a2, prepared, block_b=128)   # grid = (3,)
    jax.block_until_ready(q2)
    assert q2.shape == (B2, 1)
    q2_m = reference_forward_matched(x2, a2, params)
    assert jnp.allclose(q2, q2_m, atol=5e-3, rtol=5e-3)

    print("KERNEL_OK")
</pallas_src>

<mosaic_0001>
module attributes {stable_mosaic.version = 11 : i64} {
  func.func @_soft_q_kernel(%arg0: i32, %arg1: memref<128x128xbf16, #tpu.memory_space<vmem>>, %arg2: memref<128x256xbf16, #tpu.memory_space<vmem>>, %arg3: memref<1x256xf32, #tpu.memory_space<vmem>>, %arg4: memref<256x256xbf16, #tpu.memory_space<vmem>>, %arg5: memref<1x256xf32, #tpu.memory_space<vmem>>, %arg6: memref<8x256xf32, #tpu.memory_space<vmem>>, %arg7: memref<1xf32, #tpu.memory_space<smem>>, %arg8: memref<1x128xf32, #tpu.memory_space<vmem>>) attributes {dimension_semantics = [#tpu.dimension_semantics<parallel>], iteration_bounds = array<i64: 1>, scalar_prefetch = 0 : i64, scratch_operands = 0 : i64, tpu.core_type = #tpu.core_type<tc>, window_params = [{transform_indices = @transform_0, window_bounds = array<i64: 128, 128>}, {pipeline_mode = #tpu.pipeline_mode<synchronous>, transform_indices = @transform_1, window_bounds = array<i64: 128, 256>}, {pipeline_mode = #tpu.pipeline_mode<synchronous>, transform_indices = @transform_2, window_bounds = array<i64: 1, 256>}, {pipeline_mode = #tpu.pipeline_mode<synchronous>, transform_indices = @transform_3, window_bounds = array<i64: 256, 256>}, {pipeline_mode = #tpu.pipeline_mode<synchronous>, transform_indices = @transform_4, window_bounds = array<i64: 1, 256>}, {pipeline_mode = #tpu.pipeline_mode<synchronous>, transform_indices = @transform_5, window_bounds = array<i64: 8, 256>}, {transform_indices = @transform_6, window_bounds = array<i64: 1>}, {transform_indices = @transform_7, window_bounds = array<i64: 1, 128>}]} {
    %c0 = arith.constant 0 : index
    %c0_0 = arith.constant 0 : index
    %0 = vector.load %arg1[%c0, %c0_0] : memref<128x128xbf16, #tpu.memory_space<vmem>>, vector<128x128xbf16>
    %c0_1 = arith.constant 0 : index
    %c0_2 = arith.constant 0 : index
    %1 = vector.load %arg2[%c0_1, %c0_2] : memref<128x256xbf16, #tpu.memory_space<vmem>>, vector<128x256xbf16>
    %cst = arith.constant dense<0.000000e+00> : vector<128x256xf32>
    %2 = tpu.matmul %0, %1, %cst {dimension_numbers = #tpu.dot_dimension_numbers<[1], [0], [0], [1], [0, 0, 1, 1], [], []>} : vector<128x128xbf16>, vector<128x256xbf16>, vector<128x256xf32> -> vector<128x256xf32>
    %c0_3 = arith.constant 0 : index
    %c0_4 = arith.constant 0 : index
    %3 = vector.load %arg3[%c0_3, %c0_4] : memref<1x256xf32, #tpu.memory_space<vmem>>, vector<1x256xf32>
    %4 = vector.broadcast %3 : vector<1x256xf32> to vector<128x256xf32>
    %5 = arith.addf %2, %4 : vector<128x256xf32>
    %cst_5 = arith.constant 0.000000e+00 : f32
    %6 = vector.broadcast %cst_5 : f32 to vector<128x256xf32>
    %7 = arith.maximumf %5, %6 : vector<128x256xf32>
    %8 = arith.truncf %7 : vector<128x256xf32> to vector<128x256xbf16>
    %c0_6 = arith.constant 0 : index
    %c0_7 = arith.constant 0 : index
    %9 = vector.load %arg4[%c0_6, %c0_7] : memref<256x256xbf16, #tpu.memory_space<vmem>>, vector<256x256xbf16>
    %cst_8 = arith.constant dense<0.000000e+00> : vector<128x256xf32>
    %10 = tpu.matmul %8, %9, %cst_8 {dimension_numbers = #tpu.dot_dimension_numbers<[1], [0], [0], [1], [0, 0, 1, 1], [], []>} : vector<128x256xbf16>, vector<256x256xbf16>, vector<128x256xf32> -> vector<128x256xf32>
    %c0_9 = arith.constant 0 : index
    %c0_10 = arith.constant 0 : index
    %11 = vector.load %arg5[%c0_9, %c0_10] : memref<1x256xf32, #tpu.memory_space<vmem>>, vector<1x256xf32>
    %12 = vector.broadcast %11 : vector<1x256xf32> to vector<128x256xf32>
    %13 = arith.addf %10, %12 : vector<128x256xf32>
    %cst_11 = arith.constant 0.000000e+00 : f32
    %14 = vector.broadcast %cst_11 : f32 to vector<128x256xf32>
    %15 = arith.maximumf %13, %14 : vector<128x256xf32>
    %c0_12 = arith.constant 0 : index
    %c0_13 = arith.constant 0 : index
    %16 = vector.load %arg6[%c0_12, %c0_13] : memref<8x256xf32, #tpu.memory_space<vmem>>, vector<8x256xf32>
    %cst_14 = arith.constant dense<0.000000e+00> : vector<8x128xf32>
    %17 = tpu.matmul %16, %15, %cst_14 {dimension_numbers = #tpu.dot_dimension_numbers<[1], [1], [0], [0], [0, 0, 1, 0], [], []>} : vector<8x256xf32>, vector<128x256xf32>, vector<8x128xf32> -> vector<8x128xf32>
    %18 = vector.extract_strided_slice %17 {offsets = [0, 0], sizes = [1, 128], strides = [1, 1]} : vector<8x128xf32> to vector<1x128xf32>
    %c0_15 = arith.constant 0 : index
    %19 = memref.load %arg7[%c0_15] : memref<1xf32, #tpu.memory_space<smem>>
    %20 = vector.broadcast %19 : f32 to vector<1x128xf32>
    %21 = arith.addf %18, %20 : vector<1x128xf32>
    %c0_16 = arith.constant 0 : index
    %c0_17 = arith.constant 0 : index
    %22 = vector.load %arg8[%c0_16, %c0_17] : memref<1x128xf32, #tpu.memory_space<vmem>>, vector<1x128xf32>
    tpu.vector_store %arg8[%c0_16, %c0_17], %21 {strides = array<i32>} : memref<1x128xf32, #tpu.memory_space<vmem>>, vector<1x128xf32>,
    return
  }
  func.func @transform_0(%arg0: i32) -> (i32, i32) {
    %c0_i32 = arith.constant 0 : i32
    %c0_i32_0 = arith.constant 0 : i32
    return %arg0, %c0_i32 : i32, i32
  }
  func.func @transform_1(%arg0: i32) -> (i32, i32) {
    %c0_i32 = arith.constant 0 : i32
    %c0_i32_0 = arith.constant 0 : i32
    %c0_i32_1 = arith.constant 0 : i32
    return %c0_i32, %c0_i32_0 : i32, i32
  }
  func.func @transform_2(%arg0: i32) -> (i32, i32) {
    %c0_i32 = arith.constant 0 : i32
    %c0_i32_0 = arith.constant 0 : i32
    %c0_i32_1 = arith.constant 0 : i32
    return %c0_i32, %c0_i32_0 : i32, i32
  }
  func.func @transform_3(%arg0: i32) -> (i32, i32) {
    %c0_i32 = arith.constant 0 : i32
    %c0_i32_0 = arith.constant 0 : i32
    %c0_i32_1 = arith.constant 0 : i32
    return %c0_i32, %c0_i32_0 : i32, i32
  }
  func.func @transform_4(%arg0: i32) -> (i32, i32) {
    %c0_i32 = arith.constant 0 : i32
    %c0_i32_0 = arith.constant 0 : i32
    %c0_i32_1 = arith.constant 0 : i32
    return %c0_i32, %c0_i32_0 : i32, i32
  }
  func.func @transform_5(%arg0: i32) -> (i32, i32) {
    %c0_i32 = arith.constant 0 : i32
    %c0_i32_0 = arith.constant 0 : i32
    %c0_i32_1 = arith.constant 0 : i32
    return %c0_i32, %c0_i32_0 : i32, i32
  }
  func.func @transform_6(%arg0: i32) -> i32 {
    %c0_i32 = arith.constant 0 : i32
    %c0_i32_0 = arith.constant 0 : i32
    return %c0_i32 : i32
  }
  func.func @transform_7(%arg0: i32) -> (i32, i32) {
    %c0_i32 = arith.constant 0 : i32
    %c0_i32_0 = arith.constant 0 : i32
    return %c0_i32, %arg0 : i32, i32
  }
}

</mosaic_0001>

<bundles_post_ra>
// kernel: tpu_custom_call.1
= control target key start
LH: loop header
LB: loop body
LE: loop exit
PB: predicated region body
PF: predicated region fallthrough
CT: control target
= control target key end

     0   :  { %13 = vsyncpa [#allocation4], 0  ;;  %s1331_s0 = inlined_call_operand.hbm [shape: bf16[128,128], index: 0, kind: input, shape index: {}]   ;;  %s1332_s1 = inlined_call_operand.hbm [shape: bf16[128,256], index: 1, kind: input, shape index: {}]   ;;  %s1333_s2 = inlined_call_operand.vmem [shape: f32[1,256], index: 2, kind: input, shape index: {}]   ;;  %s1334_s3 = inlined_call_operand.hbm [shape: bf16[256,256], index: 3, kind: input, shape index: {}]   ;;  %s1335_s4 = inlined_call_operand.vmem [shape: f32[1,256], index: 4, kind: input, shape index: {}]   ;;  %s1336_s5 = inlined_call_operand.hbm [shape: f32[8,256], index: 5, kind: input, shape index: {}]   ;;  %s1337_s6 = inlined_call_operand.<no memory space> [shape: f32[1], index: 6, kind: input, shape index: {}]   ;;  %s1338_s7 = inlined_call_operand.hbm [shape: f32[1,128], index: 7, kind: output, shape index: {}]  }
   0x1   :  { %14 = vsyncpa [#allocation7], 0 }
   0x2   :  { %15 = vsyncpa [#allocation10], 0 }
   0x3   :  { %16 = vsyncpa [#allocation5], 0  ;;  %s1111_s24 = smov [#allocation6]  }
   0x4   :  { %s34_s25 = sshll.u32 %s1111_s24, 4  ;;  %s35_s25 = int_to_ptr.vmem [resolvable:$true] %s34_s25 }
   0x5   :  { %s1011_s26 = scalar_lea.vmem %s35_s25, 2048  ;;  %p1016_p1 = scmp.lt.s32.totalorder %s35_s25, %s35_s25 }
   0x6   :  { %p1012_p0 = scmp.ne.s32.totalorder %s35_s25, %s1011_s26  ;;  %p1017_p2 = scmp.lt.s32.totalorder %s1011_s26, %s1011_s26 }
   0x8   :  { %p1018_p3 = por %p1017_p2, %p1016_p1 }
   0xa   :  { %p1019_p4 = pnand %p1018_p3, %p1012_p0 }
   0xc   :  { %1022 = shalt.err (!%p1019_p4)
}
   0xd   :  { %s1112_s27 = smov 128   ;;  %s1113_s28 = smov 8  }
   0xe   :  { %40 = dma.hbm_to_vmem [thread:$0]  %s1332_s1, 2048, %s35_s25, [#allocation7], %s1112_s27, %s1112_s27, %s1113_s28  }
   0xf   :  { %s1114_s8 = smov [#allocation3]  }
  0x10   :  { %s22_s9 = sshll.u32 %s1114_s8, 4  ;;  %s23_s9 = int_to_ptr.vmem [resolvable:$true] %s22_s9 }
  0x11   :  { %s1031_s10 = scalar_lea.vmem %s23_s9, 1024  ;;  %p1036_p6 = scmp.lt.s32.totalorder %s23_s9, %s23_s9 }
  0x12   :  { %p1032_p5 = scmp.ne.s32.totalorder %s23_s9, %s1031_s10  ;;  %p1037_p7 = scmp.lt.s32.totalorder %s1031_s10, %s1031_s10 }
  0x14   :  { %p1038_p8 = por %p1037_p7, %p1036_p6 }
  0x16   :  { %p1039_p9 = pnand %p1038_p8, %p1032_p5 }
  0x18   :  { %1042 = shalt.err (!%p1039_p9)
}
  0x19   :  { %s1115_s11 = smov 64   ;;  %s1116_s12 = smov 4  }
  0x1a   :  { %28 = dma.hbm_to_vmem [thread:$0]  %s1331_s0, 1024, %s23_s9, [#allocation4], %s1115_s11, %s1115_s11, %s1116_s12  }
  0x1b   :  { %s1117_s15 = smov [#allocation8]   ;;  %s1118_s17 = smov [#allocation9]  }
  0x1c   :  { %s48_s16 = sshll.u32 %s1117_s15, 4  ;;  %s63_s1 = sshll.u32 %s1118_s17, 4  ;;  %s49_s16 = int_to_ptr.vmem [resolvable:$true] %s48_s16  ;;  %s64_s1 = int_to_ptr.vmem [resolvable:$true] %s63_s1 }
  0x1d   :  { %s1051_s18 = scalar_lea.vmem %s49_s16, 4096  ;;  %p1056_p11 = scmp.lt.s32.totalorder %s49_s16, %s49_s16 }
  0x1e   :  { %p1052_p10 = scmp.ne.s32.totalorder %s49_s16, %s1051_s18  ;;  %p1057_p12 = scmp.lt.s32.totalorder %s1051_s18, %s1051_s18 }
  0x20   :  { %p1058_p13 = por %p1057_p12, %p1056_p11 }
  0x22   :  { %p1059_p0 = pnand %p1058_p13, %p1052_p10 }
  0x24   :  { %1062 = shalt.err (!%p1059_p0)
}
  0x25   :  { %54 = dma.hbm_to_vmem [thread:$0]  %s1334_s3, 4096, %s49_s16, [#allocation7], %s1112_s27, %s1112_s27, %s1113_s28  }
  0x26   :  { %s1071_s0 = scalar_lea.vmem %s64_s1, 256  ;;  %p1076_p2 = scmp.lt.s32.totalorder %s64_s1, %s64_s1 }
  0x27   :  { %p1072_p1 = scmp.ne.s32.totalorder %s64_s1, %s1071_s0  ;;  %p1077_p3 = scmp.lt.s32.totalorder %s1071_s0, %s1071_s0 }
  0x29   :  { %p1078_p4 = por %p1077_p3, %p1076_p2 }
  0x2b   :  { %p1079_p5 = pnand %p1078_p4, %p1072_p1 }
  0x2d   :  { %1082 = shalt.err (!%p1079_p5)
}
  0x2e   :  { %66 = dma.hbm_to_vmem [thread:$0]  %s1336_s5, 256, %s64_s1, [#allocation10]  }
  0x2f   :  { %1103 = dma.done.wait [#allocation4], 1024  }
  0x30   :  { %1104 = vsyncadd [#allocation4], 4294966272 }
  0x31   :  { %1105 = dma.done.wait [#allocation7], 6144  }
  0x32   :  { %1106 = vsyncadd [#allocation7], 4294961152 }
  0x33   :  { %1107 = dma.done.wait [#allocation10], 256  }
  0x34   :  { %1108 = vsyncadd [#allocation10], 4294967040  ;;  %v1119_v0 = vmov 0   ;;  %v923_v1 = vld [vmem:[#allocation6 + $0x74] ss:$8 sps:$4 sm:$0xff]   ;;  %v947_v24 = vld [vmem:[#allocation3] sm:$0xff]   ;;  %v116_v57 = vlaneseq }
  0x35   :  { %286 = vmatprep.mubr.bf16.mxu0 %v1119_v0  ;;  %v925_v2 = vld [vmem:[#allocation6 + $0x70] ss:$8 sps:$4 sm:$0xff]   ;;  %254 = vmatprep.subr.bf16.mxu0 %v923_v1  ;;  %v926_v3 = vld [vmem:[#allocation6 + $0x64] ss:$8 sps:$4 sm:$0xff]   ;;  %v928_v4 = vld [vmem:[#allocation6 + $0x60] ss:$8 sps:$4 sm:$0xff]  }
  0x36   :  { %255 = vmatpush1.bf16.msra.mxu0 %v925_v2  ;;  %v929_v5 = vld [vmem:[#allocation6 + $0x54] ss:$8 sps:$4 sm:$0xff]   ;;  %v931_v6 = vld [vmem:[#allocation6 + $0x50] ss:$8 sps:$4 sm:$0xff]   ;;  %v932_v7 = vld [vmem:[#allocation6 + $0x44] ss:$8 sps:$4 sm:$0xff]  }
  0x37   :  { %256 = vmatprep.subr.bf16.mxu0 %v926_v3  ;;  %v934_v8 = vld [vmem:[#allocation6 + $0x40] ss:$8 sps:$4 sm:$0xff]   ;;  %v935_v9 = vld [vmem:[#allocation6 + $0x34] ss:$8 sps:$4 sm:$0xff]   ;;  %v937_v10 = vld [vmem:[#allocation6 + $0x30] ss:$8 sps:$4 sm:$0xff]  }
  0x38   :  { %v938_v11 = vld [vmem:[#allocation6 + $0x24] ss:$8 sps:$4 sm:$0xff]   ;;  %v940_v12 = vld [vmem:[#allocation6 + $0x20] ss:$8 sps:$4 sm:$0xff]   ;;  %v941_v13 = vld [vmem:[#allocation6 + $0x14] ss:$8 sps:$4 sm:$0xff]  }
  0x39   :  { %v955_v14 = vld [vmem:[#allocation8 + $0x74] ss:$8 sps:$4 sm:$0xff]   ;;  %v957_v15 = vld [vmem:[#allocation8 + $0x70] ss:$8 sps:$4 sm:$0xff]   ;;  %v958_v16 = vld [vmem:[#allocation8 + $0x64] ss:$8 sps:$4 sm:$0xff]  }
  0x3a   :  { %257 = vmatpush1.bf16.msra.mxu0 %v928_v4  ;;  %619 = vmatprep.subr.bf16.mxu1 %v955_v14  ;;  %v960_v17 = vld [vmem:[#allocation8 + $0x60] ss:$8 sps:$4 sm:$0xff]   ;;  %v943_v18 = vld [vmem:[#allocation6 + $0x10] ss:$8 sps:$4 sm:$0xff]   ;;  %v961_v19 = vld [vmem:[#allocation8 + $0x54] ss:$8 sps:$4 sm:$0xff]  }
  0x3b   :  { %258 = vmatprep.subr.bf16.mxu0 %v929_v5  ;;  %620 = vmatpush1.bf16.msra.mxu1 %v957_v15  ;;  %v944_v20 = vld [vmem:[#allocation6 + $0x4] ss:$8 sps:$4 sm:$0xff]   ;;  %v963_v21 = vld [vmem:[#allocation8 + $0x50] ss:$8 sps:$4 sm:$0xff]   ;;  %v946_v22 = vld [vmem:[#allocation6] ss:$8 sps:$4 sm:$0xff]  }
  0x3c   :  { %621 = vmatprep.subr.bf16.mxu1 %v958_v16  ;;  %v964_v23 = vld [vmem:[#allocation8 + $0x44] ss:$8 sps:$4 sm:$0xff]   ;;  %v966_v25 = vld [vmem:[#allocation8 + $0x40] ss:$8 sps:$4 sm:$0xff]   ;;  %v967_v26 = vld [vmem:[#allocation8 + $0x34] ss:$8 sps:$4 sm:$0xff]  }
  0x3d   :  { %v969_v27 = vld [vmem:[#allocation8 + $0x30] ss:$8 sps:$4 sm:$0xff]   ;;  %v970_v28 = vld [vmem:[#allocation8 + $0x24] ss:$8 sps:$4 sm:$0xff]   ;;  %v972_v30 = vld [vmem:[#allocation8 + $0x20] ss:$8 sps:$4 sm:$0xff]  }
  0x3e   :  { %259 = vmatpush1.bf16.msra.mxu0 %v931_v6  ;;  %v948_v29 = vld [vmem:[#allocation3 + $0x8] sm:$0xff]   ;;  %v973_v31 = vld [vmem:[#allocation8 + $0x14] ss:$8 sps:$4 sm:$0xff]   ;;  %v975_v32 = vld [vmem:[#allocation8 + $0x10] ss:$8 sps:$4 sm:$0xff]   ;;  %v1187_v58 = vshrl.u32 %v116_v57, 7 }
  0x3f   :  { %260 = vmatprep.subr.bf16.mxu0 %v932_v7  ;;  %622 = vmatpush1.bf16.msra.mxu1 %v960_v17  ;;  %v976_v33 = vld [vmem:[#allocation8 + $0x4] ss:$8 sps:$4 sm:$0xff]   ;;  %v949_v34 = vld [vmem:[#allocation3 + $0x10] sm:$0xff]   ;;  %v978_v35 = vld [vmem:[#allocation8] ss:$8 sps:$4 sm:$0xff]   ;;  %s1120_s25 = smov [#allocation11]  }
  0x40   :  { %623 = vmatprep.subr.bf16.mxu1 %v961_v19  ;;  %v979_v36 = vld [vmem:[#allocation8 + $0xf4] ss:$8 sps:$4 sm:$0xff]   ;;  %v981_v37 = vld [vmem:[#allocation8 + $0xf0] ss:$8 sps:$4 sm:$0xff]   ;;  %v982_v38 = vld [vmem:[#allocation8 + $0xe4] ss:$8 sps:$4 sm:$0xff]  }
  0x41   :  { %v950_v39 = vld [vmem:[#allocation3 + $0x18] sm:$0xff]   ;;  %v984_v40 = vld [vmem:[#allocation8 + $0xe0] ss:$8 sps:$4 sm:$0xff]   ;;  %v988_v43 = vld [vmem:[#allocation8 + $0xc4] ss:$8 sps:$4 sm:$0xff]   ;;  %v122_v59 = vsub.s32 1, %v1187_v58 }
  0x42   :  { %261 = vmatpush1.bf16.msra.mxu0 %v934_v8  ;;  %v985_v41 = vld [vmem:[#allocation8 + $0xd4] ss:$8 sps:$4 sm:$0xff]   ;;  %v987_v42 = vld [vmem:[#allocation8 + $0xd0] ss:$8 sps:$4 sm:$0xff]   ;;  %v951_v44 = vld [vmem:[#allocation3 + $0x20] sm:$0xff]   ;;  %v118_v60 = vsub.s32 0, %v1187_v58 }
  0x43   :  { %262 = vmatprep.subr.bf16.mxu0 %v935_v9  ;;  %624 = vmatpush1.bf16.msra.mxu1 %v963_v21  ;;  %v990_v45 = vld [vmem:[#allocation8 + $0xc0] ss:$8 sps:$4 sm:$0xff]   ;;  %v991_v46 = vld [vmem:[#allocation8 + $0xb4] ss:$8 sps:$4 sm:$0xff]   ;;  %v993_v47 = vld [vmem:[#allocation8 + $0xb0] ss:$8 sps:$4 sm:$0xff]  }
  0x44   :  { %625 = vmatprep.subr.bf16.mxu1 %v964_v23  ;;  %v952_v48 = vld [vmem:[#allocation3 + $0x28] sm:$0xff]   ;;  %v953_v49 = vld [vmem:[#allocation3 + $0x30] sm:$0xff]   ;;  %v954_v50 = vld [vmem:[#allocation3 + $0x38] sm:$0xff]   ;;  %s846_s26 = sshll.u32 %s1120_s25, 4  ;;  %s847_s26 = int_to_ptr.vmem [resolvable:$true] %s846_s26 }
  0x45   :  { %v994_v51 = vld [vmem:[#allocation8 + $0xa4] ss:$8 sps:$4 sm:$0xff]   ;;  %v996_v52 = vld [vmem:[#allocation8 + $0xa0] ss:$8 sps:$4 sm:$0xff]   ;;  %v997_v53 = vld [vmem:[#allocation8 + $0x94] ss:$8 sps:$4 sm:$0xff]   ;;  %p1088_p7 = scmp.lt.s32.totalorder %s847_s26, %s847_s26 }
  0x46   :  { %263 = vmatpush1.bf16.msra.mxu0 %v937_v10  ;;  %v999_v54 = vld [vmem:[#allocation8 + $0x90] ss:$8 sps:$4 sm:$0xff]   ;;  %v1000_v55 = vld [vmem:[#allocation8 + $0x84] ss:$8 sps:$4 sm:$0xff]   ;;  %v1002_v56 = vld [vmem:[#allocation8 + $0x80] ss:$8 sps:$4 sm:$0xff]  }
  0x47   :  { %264 = vmatprep.subr.bf16.mxu0 %v938_v11  ;;  %626 = vmatpush1.bf16.msra.mxu1 %v966_v25  ;;  %v114_v61 = vld [vmem:[%s1333_s2] sm:$0x3]  ;;  %s1083_s27 = scalar_lea.vmem %s847_s26, 16  ;;  %s1087_s28 = scalar_lea.vmem %s847_s26, 32 }
  0x48   :  { %627 = vmatprep.subr.bf16.mxu1 %v967_v26  ;;  %v1196_v63 = vrot.slane %v114_v61, %v122_v59  ;;  %p1084_p6 = scmp.ne.s32.totalorder %s847_s26, %s1083_s27  ;;  %p1089_p8 = scmp.lt.s32.totalorder %s1087_s28, %s1083_s27 }
  0x4a   :  { %265 = vmatpush1.bf16.msra.mxu0 %v940_v12  ;;  %p1090_p9 = por %p1089_p8, %p1088_p7 }
  0x4b   :  { %266 = vmatprep.subr.bf16.mxu0 %v941_v13  ;;  %628 = vmatpush1.bf16.msra.mxu1 %v969_v27 }
  0x4c   :  { %629 = vmatprep.subr.bf16.mxu1 %v970_v28  ;;  %p1091_p10 = pnand %p1090_p9, %p1084_p6 }
  0x4e   :  { %267 = vmatpush1.bf16.msra.mxu0 %v943_v18 }
  0x4f   :  { %268 = vmatprep.subr.bf16.mxu0 %v944_v20  ;;  %630 = vmatpush1.bf16.msra.mxu1 %v972_v30 }
  0x50   :  { %631 = vmatprep.subr.bf16.mxu1 %v973_v31 }
  0x52   :  { %269 = vmatpush1.bf16.msra.mxu0 %v946_v22 }
  0x53   :  { %632 = vmatpush1.bf16.msra.mxu1 %v975_v32 }
  0x54   :  { %633 = vmatprep.subr.bf16.mxu1 %v976_v33 }
  0x55   :  { %287 = vmatmul.mubr.bf16.vlgmr.msra.gmra.mxu0 %v947_v24 }
  0x56   :  { %296 = vmatprep.mubr.bf16.mxu0 %v1119_v0 }
  0x57   :  { %634 = vmatpush1.bf16.msra.mxu1 %v978_v35 }
  0x58   :  { %635 = vmatprep.subr.bf16.mxu1 %v979_v36 }
  0x5b   :  { %636 = vmatpush2.bf16.msra.mxu1 %v981_v37 }
  0x5c   :  { %637 = vmatprep.subr.bf16.mxu1 %v982_v38 }
  0x5d   :  { %297 = vmatmul.mubr.bf16.gmra.mxu0 %v948_v29 }
  0x5e   :  { %306 = vmatprep.mubr.bf16.mxu0 %v1119_v0 }
  0x5f   :  { %638 = vmatpush2.bf16.msra.mxu1 %v984_v40 }
  0x60   :  { %639 = vmatprep.subr.bf16.mxu1 %v985_v41 }
  0x63   :  { %640 = vmatpush2.bf16.msra.mxu1 %v987_v42 }
  0x64   :  { %641 = vmatprep.subr.bf16.mxu1 %v988_v43 }
  0x65   :  { %307 = vmatmul.mubr.bf16.gmra.mxu0 %v949_v34 }
  0x66   :  { %316 = vmatprep.mubr.bf16.mxu0 %v1119_v0 }
  0x67   :  { %642 = vmatpush2.bf16.msra.mxu1 %v990_v45 }
  0x68   :  { %643 = vmatprep.subr.bf16.mxu1 %v991_v46 }
  0x6b   :  { %644 = vmatpush2.bf16.msra.mxu1 %v993_v47 }
  0x6c   :  { %645 = vmatprep.subr.bf16.mxu1 %v994_v51 }
  0x6d   :  { %317 = vmatmul.mubr.bf16.gmra.mxu0 %v950_v39 }
  0x6e   :  { %326 = vmatprep.mubr.bf16.mxu0 %v1119_v0 }
  0x6f   :  { %646 = vmatpush2.bf16.msra.mxu1 %v996_v52 }
  0x70   :  { %647 = vmatprep.subr.bf16.mxu1 %v997_v53 }
  0x73   :  { %648 = vmatpush2.bf16.msra.mxu1 %v999_v54 }
  0x74   :  { %649 = vmatprep.subr.bf16.mxu1 %v1000_v55 }
  0x75   :  { %327 = vmatmul.mubr.bf16.gmra.mxu0 %v951_v44 }
  0x76   :  { %336 = vmatprep.mubr.bf16.mxu0 %v1119_v0 }
  0x77   :  { %650 = vmatpush2.bf16.msra.mxu1 %v1002_v56 }
  0x7d   :  { %337 = vmatmul.mubr.bf16.gmra.mxu0 %v952_v48 }
  0x7e   :  { %346 = vmatprep.mubr.bf16.mxu0 %v1119_v0 }
  0x85   :  { %347 = vmatmul.mubr.bf16.gmra.mxu0 %v953_v49 }
  0x86   :  { %356 = vmatprep.mubr.bf16.mxu0 %v1119_v0  ;;  %v1200_v0 = vrot.slane %v114_v61, %v118_v60 }
  0x8d   :  { %357 = vmatmul.mubr.bf16.gmra.mxu0 %v954_v50 }
 0x115   :  { %v288_v62 = vpop.f32.mrf.mxu0 }
 0x116   :  { %v289_v5 = vadd.f32 %v288_v62, %v1200_v0 }
 0x117   :  { %v290_v1 = vpop.f32.mrf.mxu0 }
 0x118   :  { %v291_v3 = vadd.f32 %v290_v1, %v1196_v63  ;;  %v367_v12 = vmax.f32 %v289_v5, 0.0 }
 0x119   :  { %v292_v2 = vpop.f32.mrf.mxu0 }
 0x11a   :  { %v293_v4 = vadd.f32 %v292_v2, %v1200_v0  ;;  %v368_v10 = vmax.f32 %v291_v3, 0.0 }
 0x11b   :  { %v294_v6 = vpop.f32.mrf.mxu0 }
 0x11c   :  { %v295_v7 = vadd.f32 %v294_v6, %v1196_v63  ;;  %v369_v8 = vmax.f32 %v293_v4, 0.0 }
 0x11d   :  { %v298_v9 = vpop.f32.mrf.mxu0 }
 0x11e   :  { %v370_v11 = vmax.f32 %v295_v7, 0.0  ;;  %v399_v15 = vpack.c.bf16 %v369_v8, %v367_v12  ;;  %v299_v19 = vadd.f32 %v298_v9, %v1200_v0 }
 0x11f   :  { %v300_v13 = vpop.f32.mrf.mxu0 }
 0x120   :  { %v400_v14 = vpack.c.bf16 %v370_v11, %v368_v10  ;;  %v301_v17 = vadd.f32 %v300_v13, %v1196_v63  ;;  %v371_v26 = vmax.f32 %v299_v19, 0.0 }
 0x121   :  { %v302_v16 = vpop.f32.mrf.mxu0 }
 0x122   :  { %v303_v18 = vadd.f32 %v302_v16, %v1200_v0  ;;  %651 = vmatprep.mubr.bf16.mxu1 %v400_v14  ;;  %v372_v24 = vmax.f32 %v301_v17, 0.0 }
 0x123   :  { %v304_v20 = vpop.f32.mrf.mxu0  ;;  %652 = vmatmul.mubr.bf16.vlgmr.msra.gmra.mxu1 %v399_v15 }
 0x124   :  { %v305_v21 = vadd.f32 %v304_v20, %v1196_v63  ;;  %v373_v22 = vmax.f32 %v303_v18, 0.0 }
 0x125   :  { %v308_v23 = vpop.f32.mrf.mxu0 }
 0x126   :  { %v374_v25 = vmax.f32 %v305_v21, 0.0  ;;  %v401_v29 = vpack.c.bf16 %v373_v22, %v371_v26  ;;  %v309_v33 = vadd.f32 %v308_v23, %v1200_v0 }
 0x127   :  { %v310_v27 = vpop.f32.mrf.mxu0 }
 0x128   :  { %v402_v28 = vpack.c.bf16 %v374_v25, %v372_v24  ;;  %v311_v31 = vadd.f32 %v310_v27, %v1196_v63  ;;  %v375_v40 = vmax.f32 %v309_v33, 0.0 }
 0x129   :  { %v312_v30 = vpop.f32.mrf.mxu0 }
 0x12a   :  { %v313_v32 = vadd.f32 %v312_v30, %v1200_v0  ;;  %661 = vmatprep.mubr.bf16.mxu1 %v402_v28  ;;  %v376_v38 = vmax.f32 %v311_v31, 0.0 }
 0x12b   :  { %v314_v34 = vpop.f32.mrf.mxu0  ;;  %662 = vmatmul.mubr.bf16.gmra.mxu1 %v401_v29 }
 0x12c   :  { %v315_v35 = vadd.f32 %v314_v34, %v1196_v63  ;;  %v377_v36 = vmax.f32 %v313_v32, 0.0 }
 0x12d   :  { %v318_v37 = vpop.f32.mrf.mxu0 }
 0x12e   :  { %v378_v39 = vmax.f32 %v315_v35, 0.0  ;;  %v403_v43 = vpack.c.bf16 %v377_v36, %v375_v40  ;;  %v319_v47 = vadd.f32 %v318_v37, %v1200_v0 }
 0x12f   :  { %v320_v41 = vpop.f32.mrf.mxu0 }
 0x130   :  { %v404_v42 = vpack.c.bf16 %v378_v39, %v376_v38  ;;  %v321_v45 = vadd.f32 %v320_v41, %v1196_v63  ;;  %v379_v54 = vmax.f32 %v319_v47, 0.0 }
 0x131   :  { %v322_v44 = vpop.f32.mrf.mxu0 }
 0x132   :  { %v323_v46 = vadd.f32 %v322_v44, %v1200_v0  ;;  %671 = vmatprep.mubr.bf16.mxu1 %v404_v42  ;;  %v380_v52 = vmax.f32 %v321_v45, 0.0 }
 0x133   :  { %v324_v48 = vpop.f32.mrf.mxu0  ;;  %672 = vmatmul.mubr.bf16.gmra.mxu1 %v403_v43 }
 0x134   :  { %v325_v49 = vadd.f32 %v324_v48, %v1196_v63  ;;  %v381_v50 = vmax.f32 %v323_v46, 0.0 }
 0x135   :  { %v328_v51 = vpop.f32.mrf.mxu0 }
 0x136   :  { %v382_v53 = vmax.f32 %v325_v49, 0.0  ;;  %v405_v57 = vpack.c.bf16 %v381_v50, %v379_v54  ;;  %v329_v2 = vadd.f32 %v328_v51, %v1200_v0  ;;  %v765_v54 = vld [vmem:[#allocation9 + $0x8] sm:$0xff] }
 0x137   :  { %v330_v55 = vpop.f32.mrf.mxu0  ;;  %830 = vmatprep.mubr.f32.mxu0 %v765_v54 }
 0x138   :  { %v406_v56 = vpack.c.bf16 %v382_v53, %v380_v52  ;;  %v331_v62 = vadd.f32 %v330_v55, %v1196_v63  ;;  %v383_v9 = vmax.f32 %v329_v2, 0.0 }
 0x139   :  { %v332_v61 = vpop.f32.mrf.mxu0 }
 0x13a   :  { %v333_v1 = vadd.f32 %v332_v61, %v1200_v0  ;;  %681 = vmatprep.mubr.bf16.mxu1 %v406_v56  ;;  %v384_v7 = vmax.f32 %v331_v62, 0.0 }
 0x13b   :  { %v334_v3 = vpop.f32.mrf.mxu0  ;;  %682 = vmatmul.mubr.bf16.gmra.mxu1 %v405_v57 }
 0x13c   :  { %v335_v4 = vadd.f32 %v334_v3, %v1196_v63  ;;  %v385_v5 = vmax.f32 %v333_v1, 0.0 }
 0x13d   :  { %v338_v6 = vpop.f32.mrf.mxu0 }
 0x13e   :  { %v386_v8 = vmax.f32 %v335_v4, 0.0  ;;  %v407_v12 = vpack.c.bf16 %v385_v5, %v383_v9  ;;  %v339_v16 = vadd.f32 %v338_v6, %v1200_v0 }
 0x13f   :  { %v340_v10 = vpop.f32.mrf.mxu0 }
 0x140   :  { %v408_v11 = vpack.c.bf16 %v386_v8, %v384_v7  ;;  %v341_v14 = vadd.f32 %v340_v10, %v1196_v63  ;;  %v387_v23 = vmax.f32 %v339_v16, 0.0 }
 0x141   :  { %v342_v13 = vpop.f32.mrf.mxu0 }
 0x142   :  { %v343_v15 = vadd.f32 %v342_v13, %v1200_v0  ;;  %691 = vmatprep.mubr.bf16.mxu1 %v408_v11  ;;  %v388_v21 = vmax.f32 %v341_v14, 0.0 }
 0x143   :  { %v344_v17 = vpop.f32.mrf.mxu0  ;;  %692 = vmatmul.mubr.bf16.gmra.mxu1 %v407_v12 }
 0x144   :  { %v345_v18 = vadd.f32 %v344_v17, %v1196_v63  ;;  %v389_v19 = vmax.f32 %v343_v15, 0.0 }
 0x145   :  { %v348_v20 = vpop.f32.mrf.mxu0 }
 0x146   :  { %v390_v22 = vmax.f32 %v345_v18, 0.0  ;;  %v409_v26 = vpack.c.bf16 %v389_v19, %v387_v23  ;;  %v349_v30 = vadd.f32 %v348_v20, %v1200_v0 }
 0x147   :  { %v350_v24 = vpop.f32.mrf.mxu0 }
 0x148   :  { %v410_v25 = vpack.c.bf16 %v390_v22, %v388_v21  ;;  %v351_v28 = vadd.f32 %v350_v24, %v1196_v63  ;;  %v391_v37 = vmax.f32 %v349_v30, 0.0  ;;  %v447_v22 = vld [vmem:[%s1335_s4] sm:$0x3] }
 0x149   :  { %v352_v27 = vpop.f32.mrf.mxu0  ;;  %v1271_v24 = vrot.slane %v447_v22, %v118_v60 }
 0x14a   :  { %v353_v29 = vadd.f32 %v352_v27, %v1200_v0  ;;  %701 = vmatprep.mubr.bf16.mxu1 %v410_v25  ;;  %v392_v35 = vmax.f32 %v351_v28, 0.0 }
 0x14b   :  { %v354_v31 = vpop.f32.mrf.mxu0  ;;  %702 = vmatmul.mubr.bf16.gmra.mxu1 %v409_v26  ;;  %v1275_v26 = vrot.slane %v447_v22, %v122_v59 }
 0x14c   :  { %v355_v32 = vadd.f32 %v354_v31, %v1196_v63  ;;  %v393_v33 = vmax.f32 %v353_v29, 0.0 }
 0x14d   :  { %v358_v34 = vpop.f32.mrf.mxu0 }
 0x14e   :  { %v394_v36 = vmax.f32 %v355_v32, 0.0  ;;  %v411_v40 = vpack.c.bf16 %v393_v33, %v391_v37  ;;  %v359_v44 = vadd.f32 %v358_v34, %v1200_v0 }
 0x14f   :  { %v360_v38 = vpop.f32.mrf.mxu0 }
 0x150   :  { %v412_v39 = vpack.c.bf16 %v394_v36, %v392_v35  ;;  %v361_v42 = vadd.f32 %v360_v38, %v1196_v63  ;;  %v395_v50 = vmax.f32 %v359_v44, 0.0 }
 0x151   :  { %v362_v41 = vpop.f32.mrf.mxu0 }
 0x152   :  { %v363_v43 = vadd.f32 %v362_v41, %v1200_v0  ;;  %711 = vmatprep.mubr.bf16.mxu1 %v412_v39  ;;  %v396_v48 = vmax.f32 %v361_v42, 0.0 }
 0x153   :  { %v364_v45 = vpop.f32.mrf.mxu0  ;;  %712 = vmatmul.mubr.bf16.gmra.mxu1 %v411_v40 }
 0x154   :  { %v365_v46 = vadd.f32 %v364_v45, %v1196_v63  ;;  %v397_v47 = vmax.f32 %v363_v43, 0.0 }
 0x156   :  { %v398_v49 = vmax.f32 %v365_v46, 0.0  ;;  %v413_v52 = vpack.c.bf16 %v397_v47, %v395_v50 }
 0x158   :  { %v414_v51 = vpack.c.bf16 %v398_v49, %v396_v48 }
 0x15a   :  { %721 = vmatprep.mubr.bf16.mxu1 %v414_v51 }
 0x15b   :  { %722 = vmatmul.mubr.bf16.gmra.mxu1 %v413_v52 }
 0x1e3   :  { %v1234_v53 = vpop.f32.mrf.mxu1 }
 0x1e5   :  { %v1236_v55 = vpop.f32.mrf.mxu1 }
 0x1e7   :  { %v1238_v56 = vpop.f32.mrf.mxu1 }
 0x1e9   :  { %v1240_v0 = vpop.f32.mrf.mxu1 }
 0x1eb   :  { %v1242_v57 = vpop.f32.mrf.mxu1 }
 0x1ed   :  { %v1244_v63 = vpop.f32.mrf.mxu1 }
 0x1ef   :  { %v1246_v61 = vpop.f32.mrf.mxu1 }
 0x1f1   :  { %v1248_v62 = vpop.f32.mrf.mxu1 }
 0x1f3   :  { %v1250_v1 = vpop.f32.mrf.mxu1 }
 0x1f5   :  { %v1252_v2 = vpop.f32.mrf.mxu1 }
 0x1f7   :  { %v1254_v3 = vpop.f32.mrf.mxu1 }
 0x1f9   :  { %v1256_v4 = vpop.f32.mrf.mxu1 }
 0x1fb   :  { %v1258_v5 = vpop.f32.mrf.mxu1 }
 0x1fd   :  { %v1260_v6 = vpop.f32.mrf.mxu1 }
 0x1ff   :  { %v1262_v7 = vpop.f32.mrf.mxu1 }
 0x201   :  { %v1264_v8 = vpop.f32.mrf.mxu1 }
 0x203   :  { %v693_v9 = vpop.f32.mrf.mxu1 }
 0x204   :  { %v694_v54 = vadd.f32 %v693_v9, %v1271_v24  ;;  %v684_v9 = vadd.f32 %v1258_v5, %v1271_v24  ;;  %v674_v5 = vadd.f32 %v1250_v1, %v1271_v24  ;;  %v664_v1 = vadd.f32 %v1242_v57, %v1271_v24 }
 0x205   :  { %v695_v10 = vpop.f32.mrf.mxu1  ;;  %v654_v57 = vadd.f32 %v1234_v53, %v1271_v24 }
 0x206   :  { %v696_v51 = vadd.f32 %v695_v10, %v1275_v26 }
 0x207   :  { %v697_v11 = vpop.f32.mrf.mxu1 }
 0x208   :  { %v698_v49 = vadd.f32 %v697_v11, %v1271_v24  ;;  %v686_v11 = vadd.f32 %v1260_v6, %v1275_v26  ;;  %v676_v6 = vadd.f32 %v1252_v2, %v1275_v26  ;;  %v666_v2 = vadd.f32 %v1244_v63, %v1275_v26 }
 0x209   :  { %v699_v12 = vpop.f32.mrf.mxu1  ;;  %v656_v63 = vadd.f32 %v1236_v55, %v1275_v26 }
 0x20a   :  { %v700_v47 = vadd.f32 %v699_v12, %v1275_v26  ;;  %v688_v12 = vadd.f32 %v1262_v7, %v1271_v24  ;;  %v678_v7 = vadd.f32 %v1254_v3, %v1271_v24  ;;  %v741_v22 = vmax.f32 %v676_v6, 0.0 }
 0x20b   :  { %v703_v13 = vpop.f32.mrf.mxu1  ;;  %v668_v3 = vadd.f32 %v1246_v61, %v1271_v24  ;;  %v658_v61 = vadd.f32 %v1238_v56, %v1271_v24  ;;  %v837_v56 = vstv %s1337_s6 }
 0x20c   :  { %v704_v45 = vadd.f32 %v703_v13, %v1271_v24  ;;  %v751_v52 = vmax.f32 %v700_v47, 0.0  ;;  %v690_v13 = vadd.f32 %v1264_v8, %v1275_v26  ;;  %v680_v8 = vadd.f32 %v1256_v4, %v1275_v26 }
 0x20d   :  { %v705_v14 = vpop.f32.mrf.mxu1  ;;  %v670_v4 = vadd.f32 %v1248_v62, %v1275_v26  ;;  %v660_v62 = vadd.f32 %v1240_v0, %v1275_v26  ;;  %v732_v0 = vmax.f32 %v654_v57, 0.0 }
 0x20e   :  { %v706_v43 = vadd.f32 %v705_v14, %v1275_v26  ;;  %v752_v50 = vmax.f32 %v704_v45, 0.0  ;;  %v750_v14 = vmax.f32 %v698_v49, 0.0  ;;  %v747_v10 = vmax.f32 %v690_v13, 0.0 }
 0x20f   :  { %v707_v15 = vpop.f32.mrf.mxu1 }
 0x210   :  { %v708_v41 = vadd.f32 %v707_v15, %v1271_v24  ;;  %v753_v48 = vmax.f32 %v706_v43, 0.0  ;;  %v749_v15 = vmax.f32 %v696_v51, 0.0 }
 0x211   :  { %v709_v16 = vpop.f32.mrf.mxu1 }
 0x212   :  { %v710_v39 = vadd.f32 %v709_v16, %v1275_v26  ;;  %v754_v46 = vmax.f32 %v708_v41, 0.0  ;;  %v748_v16 = vmax.f32 %v694_v54, 0.0 }
 0x213   :  { %v713_v17 = vpop.f32.mrf.mxu1 }
 0x214   :  { %v714_v37 = vadd.f32 %v713_v17, %v1271_v24  ;;  %v755_v44 = vmax.f32 %v710_v39, 0.0  ;;  %v746_v17 = vmax.f32 %v688_v12, 0.0 }
 0x215   :  { %v715_v18 = vpop.f32.mrf.mxu1 }
 0x216   :  { %v716_v35 = vadd.f32 %v715_v18, %v1275_v26  ;;  %v756_v42 = vmax.f32 %v714_v37, 0.0  ;;  %v745_v18 = vmax.f32 %v686_v11, 0.0 }
 0x217   :  { %v717_v19 = vpop.f32.mrf.mxu1 }
 0x218   :  { %v718_v58 = vadd.f32 %v717_v19, %v1271_v24  ;;  %v757_v40 = vmax.f32 %v716_v35, 0.0  ;;  %v744_v19 = vmax.f32 %v684_v9, 0.0 }
 0x219   :  { %v719_v20 = vpop.f32.mrf.mxu1 }
 0x21a   :  { %v720_v34 = vadd.f32 %v719_v20, %v1275_v26  ;;  %v758_v38 = vmax.f32 %v718_v58, 0.0  ;;  %v743_v20 = vmax.f32 %v680_v8, 0.0 }
 0x21b   :  { %v723_v21 = vpop.f32.mrf.mxu1 }
 0x21c   :  { %v724_v32 = vadd.f32 %v723_v21, %v1271_v24  ;;  %v759_v36 = vmax.f32 %v720_v34, 0.0  ;;  %v742_v21 = vmax.f32 %v678_v7, 0.0 }
 0x21d   :  { %v725_v23 = vpop.f32.mrf.mxu1 }
 0x21e   :  { %v726_v29 = vadd.f32 %v725_v23, %v1275_v26  ;;  %v760_v59 = vmax.f32 %v724_v32, 0.0  ;;  %v740_v23 = vmax.f32 %v674_v5, 0.0  ;;  %v733_v32 = vmax.f32 %v656_v63, 0.0 }
 0x21f   :  { %v727_v25 = vpop.f32.mrf.mxu1 }
 0x220   :  { %v728_v27 = vadd.f32 %v727_v25, %v1271_v24  ;;  %v761_v60 = vmax.f32 %v726_v29, 0.0  ;;  %v739_v25 = vmax.f32 %v670_v4, 0.0  ;;  %v736_v29 = vmax.f32 %v664_v1, 0.0 }
 0x221   :  { %v729_v28 = vpop.f32.mrf.mxu1 }
 0x222   :  { %v730_v30 = vadd.f32 %v729_v28, %v1275_v26  ;;  %v762_v33 = vmax.f32 %v728_v27, 0.0  ;;  %v738_v27 = vmax.f32 %v668_v3, 0.0  ;;  %v737_v28 = vmax.f32 %v666_v2, 0.0 }
 0x224   :  { %v763_v31 = vmax.f32 %v730_v30, 0.0  ;;  %v735_v30 = vmax.f32 %v660_v62, 0.0 }
 0x226   :  { %766 = vmatprep.subr.mxu0 %v763_v31  ;;  %v734_v31 = vmax.f32 %v658_v61, 0.0 }
 0x227   :  { %767 = vmatpush1.xpose.msra.mxu0 %v762_v33  ;;  %v764_v33 = vld [vmem:[#allocation9] sm:$0xff] }
 0x228   :  { %768 = vmatprep.subr.mxu0 %v761_v60 }
 0x22b   :  { %769 = vmatpush1.xpose.msra.mxu0 %v760_v59 }
 0x22c   :  { %770 = vmatprep.subr.mxu0 %v759_v36 }
 0x22f   :  { %771 = vmatpush1.xpose.msra.mxu0 %v758_v38 }
 0x230   :  { %772 = vmatprep.subr.mxu0 %v757_v40 }
 0x233   :  { %773 = vmatpush1.xpose.msra.mxu0 %v756_v42 }
 0x234   :  { %774 = vmatprep.subr.mxu0 %v755_v44 }
 0x237   :  { %775 = vmatpush1.xpose.msra.mxu0 %v754_v46 }
 0x238   :  { %776 = vmatprep.subr.mxu0 %v753_v48 }
 0x23b   :  { %777 = vmatpush1.xpose.msra.mxu0 %v752_v50 }
 0x23c   :  { %778 = vmatprep.subr.mxu0 %v751_v52 }
 0x23f   :  { %779 = vmatpush1.xpose.msra.mxu0 %v750_v14 }
 0x240   :  { %780 = vmatprep.subr.mxu0 %v749_v15 }
 0x243   :  { %781 = vmatpush1.xpose.msra.mxu0 %v748_v16 }
 0x244   :  { %782 = vmatprep.subr.mxu0 %v747_v10 }
 0x247   :  { %783 = vmatpush1.xpose.msra.mxu0 %v746_v17 }
 0x248   :  { %784 = vmatprep.subr.mxu0 %v745_v18 }
 0x24b   :  { %785 = vmatpush1.xpose.msra.mxu0 %v744_v19 }
 0x24c   :  { %786 = vmatprep.subr.mxu0 %v743_v20 }
 0x24f   :  { %787 = vmatpush1.xpose.msra.mxu0 %v742_v21 }
 0x250   :  { %788 = vmatprep.subr.mxu0 %v741_v22 }
 0x253   :  { %789 = vmatpush1.xpose.msra.mxu0 %v740_v23 }
 0x254   :  { %790 = vmatprep.subr.mxu0 %v739_v25 }
 0x257   :  { %791 = vmatpush1.xpose.msra.mxu0 %v738_v27 }
 0x258   :  { %792 = vmatprep.subr.mxu0 %v737_v28 }
 0x25b   :  { %793 = vmatpush1.xpose.msra.mxu0 %v736_v29 }
 0x25c   :  { %794 = vmatprep.subr.mxu0 %v735_v30 }
 0x25f   :  { %795 = vmatpush1.xpose.msra.mxu0 %v734_v31 }
 0x260   :  { %796 = vmatprep.subr.mxu0 %v733_v32 }
 0x263   :  { %797 = vmatpush1.xpose.msra.mxu0 %v732_v0 }
 0x266   :  { %831 = vmatmul.mubr.f32.vlgmr.msra.gmra.mxu0 %v764_v33 }
 0x326   :  { %v832_v55 = vpop.f32.mrf.mxu0 }
 0x327   :  { %v838_v26 = vadd.f32 %v837_v56, %v832_v55 }
 0x328   :  { %v834_v34 = vpop.f32.mrf.mxu0 }
 0x329   :  { %839 = vst [vmem:[#allocation11] sm:$0x1] %v838_v26 }
 0x32a   :  { %1094 = shalt.err (!%p1091_p10)
}
 0x32b   :  { %849 = dma.vmem_to_hbm [thread:$0]  %s847_s26, 16, %s1338_s7, [#allocation5]  }
 0x32c   :  { %1109 = dma.done.wait [#allocation5], 16  }
 0x32d   :  { %1110 = vsyncadd [#allocation5], 4294967280 }
 0x32e   :  { %853 = vsyncpa [#allocation4], 1 }
 0x32f   :  { %854 = vsyncpa [#allocation7], 1 }
 0x330   :  { %855 = vsyncpa [#allocation10], 1 }
 0x331   :  { %856 = vsyncpa [#allocation5], 1 }

</bundles_post_ra>
